<compile_context>
chip_gen: v5e
topology: v5e:2x2
jax: 0.10.0
libtpu: 0.0.40
codegen_flags: <defaults>
</compile_context>

<pallas_src>
import jax
import jax.numpy as jnp
import numpy as np
from jax.experimental import pallas as pl
from jax.experimental.pallas import tpu as pltpu


# --------------------------------------------------------------------------------
# Shared in-kernel helper
# --------------------------------------------------------------------------------
def _compute_z(txt, img):
    """z[b, j, c] = txt[b, c] * sum_k img[b, c % idim, k, j]   (channels-last)."""
    bb, idim, nw, nh = img.shape
    C = txt.shape[-1]
    rep = C // idim
    txt = txt.astype(jnp.float32)                  # (bb, 1, C)     C on lanes
    img = img.astype(jnp.float32)                  # (bb, idim, nw, nh)
    colsum = jnp.sum(img, axis=2)                  # (bb, idim, nh) sublane reduce over nw
    cs_t = jnp.transpose(colsum, (0, 2, 1))        # (bb, nh, idim) small XLU transpose
    cs_cl = jnp.tile(cs_t, (1, 1, rep))            # (bb, nh, C)    tiled channel c -> c % idim
    return txt * cs_cl                             # (bb, nh, C)


# --------------------------------------------------------------------------------
# Kernel 1: per-batch BN partial sums (z stays in VMEM, never written to HBM)
# --------------------------------------------------------------------------------
def _stats_kernel(txt_ref, img_ref, stats_ref):
    z = _compute_z(txt_ref[...], img_ref[...])                       # (bb, nh, C)
    stats_ref[:, 0:1, :] = jnp.sum(z, axis=1, keepdims=True)         # (bb, 1, C)
    stats_ref[:, 1:2, :] = jnp.sum(z * z, axis=1, keepdims=True)     # (bb, 1, C)


# --------------------------------------------------------------------------------
# Kernel 2: recompute z, BN affine (pre-folded scale/shift), 3 x (1x1 conv + ReLU),
#           direct NCHW store (lane-dense nh*nh last dim, broadcast along i).
# --------------------------------------------------------------------------------
def _bn_conv_kernel(txt_ref, img_ref, scale_ref, shift_ref,
                    w1_ref, b1_ref, w2_ref, b2_ref, w3_ref, b3_ref,
                    out_ref):
    bb = txt_ref.shape[0]
    C = txt_ref.shape[-1]
    nh = img_ref.shape[-1]

    z = _compute_z(txt_ref[...], img_ref[...])                       # (bb, nh, C)
    y = z.reshape(bb * nh, C) * scale_ref[...] + shift_ref[...]      # folded BN affine

    hi = jax.lax.Precision.HIGHEST  # match f32 reference; use bf16 weights for speed instead
    for w_ref, b_ref in ((w1_ref, b1_ref), (w2_ref, b2_ref), (w3_ref, b3_ref)):
        y = jnp.dot(y, w_ref[...], precision=hi,
                    preferred_element_type=jnp.float32) + b_ref[...]
        y = jnp.maximum(y, 0.0)

    yT = jnp.transpose(y.reshape(bb, nh, C), (0, 2, 1))              # (bb, C, nh)
    # out[b, c, i*nh + j] = yT[b, c, j] for every i -> tile along the lane-dense
    # flattened spatial axis (width nh*nh).
    out_ref[...] = jnp.tile(yT, (1, 1, nh)).astype(out_ref.dtype)


# --------------------------------------------------------------------------------
# Tiling / VMEM planner
# --------------------------------------------------------------------------------
def _plan(B, idim, nw, nh, C, batch_block):
    itemsize = 4
    # constant-index blocks (weights, biases, scale/shift): 2 pipeline buffers each
    const_bytes = 2 * itemsize * (3 * C * C + 8 * C)
    # per-batch pipelined blocks in kernel 2 (txt, img, out; 2 buffers each) plus
    # a few (nh, C) in-kernel temporaries (z / y / yT).
    per_batch = 2 * itemsize * (C + idim * nw * nh + C * nh * nh) + 6 * itemsize * nh * C

    if batch_block is None:
        budget = 12 * 2**20          # fits the v5e 16 MiB scoped default with headroom
        bb = 1
        for cand in range(1, B + 1):
            if B % cand:
                continue
            if B >= 2 and B // cand < 2:
                break                # keep >= 2 grid steps so both v7x cores get work
            if const_bytes + cand * per_batch > budget:
                break
            bb = cand
            if cand * nh >= 256:     # enough MXU rows on v6e/v7x (>=128 covers v5e)
                break
    else:
        assert B % batch_block == 0
        bb = batch_block

    est = const_bytes + bb * per_batch
    vmem_limit = min(2 * est, 48 * 2**20) if est > 12 * 2**20 else None
    return bb, vmem_limit


# --------------------------------------------------------------------------------
# Forward wrapper
# --------------------------------------------------------------------------------
def multiplication_fusion_forward(txt_feat, img_feat, params, *,
                                  text_dim, eps=1e-5, batch_block=None):
    B, idim, nw, nh = img_feat.shape
    T = txt_feat.shape[1]
    assert T == text_dim
    assert idim < text_dim and text_dim % idim == 0, "only the idim < text_dim branch"
    C = text_dim                                   # num_mmc_units

    bb, vmem_limit = _plan(B, idim, nw, nh, C, batch_block)
    nb = B // bb
    cparams = pltpu.CompilerParams(dimension_semantics=("parallel",),
                                   vmem_limit_bytes=vmem_limit)

    txt3 = txt_feat.astype(jnp.float32).reshape(B, 1, C)   # lane-dense text vector
    img = img_feat.astype(jnp.float32)

    # --- Kernel 1: per-batch BN partial sums only --------------------------------
    stats = pl.pallas_call(
        _stats_kernel,
        out_shape=jax.ShapeDtypeStruct((B, 2, C), jnp.float32),
        grid_spec=pltpu.PrefetchScalarGridSpec(
            num_scalar_prefetch=0,
            grid=(nb,),
            in_specs=[
                pl.BlockSpec((bb, 1, C), lambda i: (i, 0, 0)),              # txt
                pl.BlockSpec((bb, idim, nw, nh), lambda i: (i, 0, 0, 0)),   # img
            ],
            out_specs=pl.BlockSpec((bb, 2, C), lambda i: (i, 0, 0)),
        ),
        compiler_params=cparams,
    )(txt3, img)

    # --- Tiny XLA epilogue: fold global BN statistics into one scale/shift -------
    inv_n = 1.0 / (B * nh)                     # each reduced row stands for nh NCHW rows
    tot = jnp.sum(stats, axis=0)               # (2, C)
    mean = tot[0] * inv_n
    var = jnp.maximum(tot[1] * inv_n - mean * mean, 0.0)   # guard rounding-negative var
    gamma = params["gamma"].astype(jnp.float32)
    beta = params["beta"].astype(jnp.float32)
    scale = gamma * jax.lax.rsqrt(var + eps)
    shift = beta - mean * scale
    scale = scale.reshape(1, C)
    shift = shift.reshape(1, C)

    # --- Kernel 2: BN affine + 3x(1x1 conv + ReLU), NCHW output ------------------
    flat_params = []
    for w, b in params["convs"]:
        # store W^T so y_row = x_row @ W^T + b
        flat_params += [w.T.astype(jnp.float32), b.reshape(1, C).astype(jnp.float32)]

    in_specs = [
        pl.BlockSpec((bb, 1, C), lambda i: (i, 0, 0)),              # txt (pipelined)
        pl.BlockSpec((bb, idim, nw, nh), lambda i: (i, 0, 0, 0)),   # img (pipelined)
        pl.BlockSpec((1, C), lambda i: (0, 0)),                     # scale (resident)
        pl.BlockSpec((1, C), lambda i: (0, 0)),                     # shift
        pl.BlockSpec((C, C), lambda i: (0, 0)),                     # w1^T
        pl.BlockSpec((1, C), lambda i: (0, 0)),                     # b1
        pl.BlockSpec((C, C), lambda i: (0, 0)),                     # w2^T
        pl.BlockSpec((1, C), lambda i: (0, 0)),                     # b2
        pl.BlockSpec((C, C), lambda i: (0, 0)),                     # w3^T
        pl.BlockSpec((1, C), lambda i: (0, 0)),                     # b3
    ]

    out_flat = pl.pallas_call(
        _bn_conv_kernel,
        out_shape=jax.ShapeDtypeStruct((B, C, nh * nh), jnp.float32),
        grid_spec=pltpu.PrefetchScalarGridSpec(
            num_scalar_prefetch=0,
            grid=(nb,),
            in_specs=in_specs,
            out_specs=pl.BlockSpec((bb, C, nh * nh), lambda i: (i, 0, 0)),
        ),
        compiler_params=cparams,
    )(txt3, img, scale, shift, *flat_params)

    # Trailing-dim split only: free reshape, no HBM transpose pass.
    return out_flat.reshape(B, C, nh, nh)


# --------------------------------------------------------------------------------
# Pure-JAX reference mirroring the PyTorch forward (idim < text_dim branch)
# --------------------------------------------------------------------------------
def reference_forward(txt_feat, img_feat, params, *, text_dim, eps=1e-5):
    B, idim, nw, nh = img_feat.shape
    T = txt_feat.shape[1]
    rep = text_dim // idim
    hi = jax.lax.Precision.HIGHEST
    txt_t = jnp.broadcast_to(txt_feat[:, :, None, None], (B, T, nh, nw))
    img_t = jnp.tile(img_feat, (1, rep, 1, 1))
    mm = jnp.einsum("bcik,bckj->bcij", txt_t, img_t, precision=hi)
    mean = jnp.mean(mm, axis=(0, 2, 3), keepdims=True)
    var = jnp.mean((mm - mean) ** 2, axis=(0, 2, 3), keepdims=True)
    y = (mm - mean) * jax.lax.rsqrt(var + eps)
    y = y * params["gamma"][None, :, None, None] + params["beta"][None, :, None, None]
    for w, b in params["convs"]:
        y = jnp.einsum("oc,bchw->bohw", w, y, precision=hi) + b[None, :, None, None]
        y = jnp.maximum(y, 0.0)
    return y


if __name__ == "__main__":
    # Small shapes consistent with the module: config.text_dim=8, img_dim=4 (<text_dim),
    # so num_mmc_units = 8.
    B, idim, nw, nh = 2, 4, 8, 16
    text_dim = 8
    C = text_dim

    key = jax.random.PRNGKey(0)
    ks = jax.random.split(key, 12)
    txt_feat = jax.random.normal(ks[0], (B, text_dim), jnp.float32)
    img_feat = jax.random.normal(ks[1], (B, idim, nw, nh), jnp.float32)

    # Deterministic, synthetic parameters (BatchNorm affine + three 1x1 conv layers).
    gamma = 1.0 + 0.1 * jax.random.normal(ks[2], (C,), jnp.float32)
    beta = 0.1 * jax.random.normal(ks[3], (C,), jnp.float32)
    convs = []
    for i in range(3):
        w = 0.3 * jax.random.normal(ks[4 + 2 * i], (C, C), jnp.float32)  # (Cout, Cin)
        b = 0.1 * jax.random.normal(ks[5 + 2 * i], (C,), jnp.float32)
        convs.append((w, b))
    params = {"gamma": gamma, "beta": beta, "convs": convs}

    out = multiplication_fusion_forward(txt_feat, img_feat, params, text_dim=text_dim)
    out = jax.block_until_ready(out)

    ref = reference_forward(txt_feat, img_feat, params, text_dim=text_dim)
    np.testing.assert_allclose(np.asarray(out), np.asarray(ref), rtol=3e-4, atol=3e-4)

    print("KERNEL_OK")
</pallas_src>

<mosaic_0001>
module attributes {stable_mosaic.version = 11 : i64} {
  func.func @_stats_kernel(%arg0: i32, %arg1: memref<1x1x8xf32, #tpu.memory_space<vmem>>, %arg2: memref<1x4x8x16xf32, #tpu.memory_space<vmem>>, %arg3: memref<1x2x8xf32, #tpu.memory_space<vmem>>) attributes {dimension_semantics = [#tpu.dimension_semantics<parallel>], iteration_bounds = array<i64: 2>, scalar_prefetch = 0 : i64, scratch_operands = 0 : i64, tpu.core_type = #tpu.core_type<tc>, window_params = [{transform_indices = @transform_0, window_bounds = array<i64: 1, 1, 8>}, {transform_indices = @transform_1, window_bounds = array<i64: 1, 4, 8, 16>}, {transform_indices = @transform_2, window_bounds = array<i64: 1, 2, 8>}]} {
    %c0 = arith.constant 0 : index
    %c0_0 = arith.constant 0 : index
    %c0_1 = arith.constant 0 : index
    %0 = vector.load %arg1[%c0, %c0_0, %c0_1] : memref<1x1x8xf32, #tpu.memory_space<vmem>>, vector<1x1x8xf32>
    %c0_2 = arith.constant 0 : index
    %c0_3 = arith.constant 0 : index
    %c0_4 = arith.constant 0 : index
    %c0_5 = arith.constant 0 : index
    %1 = vector.load %arg2[%c0_2, %c0_3, %c0_4, %c0_5] : memref<1x4x8x16xf32, #tpu.memory_space<vmem>>, vector<1x4x8x16xf32>
    %cst = arith.constant dense<0.000000e+00> : vector<1x4x16xf32>
    %2 = vector.multi_reduction <add>, %1, %cst [2] : vector<1x4x8x16xf32> to vector<1x4x16xf32>
    %3 = tpu.transpose %2, [0, 2, 1] : vector<1x4x16xf32> -> vector<1x16x4xf32>
    %4 = tpu.concatenate %3, %3 in 2 : vector<1x16x4xf32>, vector<1x16x4xf32> -> vector<1x16x8xf32>
    %5 = vector.broadcast %0 : vector<1x1x8xf32> to vector<1x16x8xf32>
    %6 = arith.mulf %5, %4 : vector<1x16x8xf32>
    %cst_6 = arith.constant dense<0.000000e+00> : vector<1x8xf32>
    %7 = vector.multi_reduction <add>, %6, %cst_6 [1] : vector<1x16x8xf32> to vector<1x8xf32>
    %8 = vector.shape_cast %7 : vector<1x8xf32> to vector<1x1x8xf32>
    %c0_7 = arith.constant 0 : index
    %c0_8 = arith.constant 0 : index
    %c0_9 = arith.constant 0 : index
    %9 = vector.load %arg3[%c0_7, %c0_8, %c0_9] : memref<1x2x8xf32, #tpu.memory_space<vmem>>, vector<1x1x8xf32>
    tpu.vector_store %arg3[%c0_7, %c0_8, %c0_9], %8 {strides = array<i32>} : memref<1x2x8xf32, #tpu.memory_space<vmem>>, vector<1x1x8xf32>,
    %10 = arith.mulf %6, %6 : vector<1x16x8xf32>
    %cst_10 = arith.constant dense<0.000000e+00> : vector<1x8xf32>
    %11 = vector.multi_reduction <add>, %10, %cst_10 [1] : vector<1x16x8xf32> to vector<1x8xf32>
    %12 = vector.shape_cast %11 : vector<1x8xf32> to vector<1x1x8xf32>
    %c0_11 = arith.constant 0 : index
    %c1 = arith.constant 1 : index
    %c0_12 = arith.constant 0 : index
    %13 = vector.load %arg3[%c0_11, %c1, %c0_12] : memref<1x2x8xf32, #tpu.memory_space<vmem>>, vector<1x1x8xf32>
    tpu.vector_store %arg3[%c0_11, %c1, %c0_12], %12 {strides = array<i32>} : memref<1x2x8xf32, #tpu.memory_space<vmem>>, vector<1x1x8xf32>,
    return
  }
  func.func @transform_0(%arg0: i32) -> (i32, i32, i32) {
    %c0_i32 = arith.constant 0 : i32
    %c0_i32_0 = arith.constant 0 : i32
    %c0_i32_1 = arith.constant 0 : i32
    return %arg0, %c0_i32, %c0_i32_0 : i32, i32, i32
  }
  func.func @transform_1(%arg0: i32) -> (i32, i32, i32, i32) {
    %c0_i32 = arith.constant 0 : i32
    %c0_i32_0 = arith.constant 0 : i32
    %c0_i32_1 = arith.constant 0 : i32
    %c0_i32_2 = arith.constant 0 : i32
    return %arg0, %c0_i32, %c0_i32_0, %c0_i32_1 : i32, i32, i32, i32
  }
  func.func @transform_2(%arg0: i32) -> (i32, i32, i32) {
    %c0_i32 = arith.constant 0 : i32
    %c0_i32_0 = arith.constant 0 : i32
    %c0_i32_1 = arith.constant 0 : i32
    return %arg0, %c0_i32, %c0_i32_0 : i32, i32, i32
  }
}

</mosaic_0001>

<bundles_post_ra>
// kernel: tpu_custom_call.1
= control target key start
LH: loop header
LB: loop body
LE: loop exit
PB: predicated region body
PF: predicated region fallthrough
CT: control target
= control target key end

     0   :  { %7 = vsyncpa [#allocation3], 0  ;;  %s807_s0 = inlined_call_operand.hbm [shape: f32[2,1,8], index: 0, kind: input, shape index: {}]   ;;  %s808_s1 = inlined_call_operand.hbm [shape: f32[2,4,8,16], index: 1, kind: input, shape index: {}]   ;;  %s809_s2 = inlined_call_operand.hbm [shape: f32[2,2,8], index: 2, kind: output, shape index: {}]  }
   0x1   :  { %9 = vsyncpa [#allocation3 + $0x1], 0 }
   0x2   :  { %10 = vsyncpa [#allocation6], 0 }
   0x3   :  { %12 = vsyncpa [#allocation6 + $0x1], 0 }
   0x4   :  { %13 = vsyncpa [#allocation4], 0 }
   0x5   :  { %15 = vsyncpa [#allocation4 + $0x1], 0  ;;  %s641_s9 = smov 0   ;;  %s643_s10 = smov 0  }
   0x6   :  { %s645_s11 = smov 0   ;;  %s647_s12 = smov 0  }
   0x7 LB: > { %s662_s13 = sadd.s32 4294967295, %s621_s12   ;;  %s421_s14 = sadd.s32 4294967294, %s621_s12   ;;  %s621_s12 = sphi %s647_s12, %s820_s12   ;;  %s617_s11 = sphi %s645_s11, %s819_s11   ;;  %s613_s10 = sphi %s643_s10, %s818_s10   ;;  %s609_s9 = sphi %s641_s9, %s817_s9  }
   0x8   : > { %s666_s15 = sadd.s32 1, %s621_s12   ;;  %s28_s16 = sadd.s32 1, %s617_s11 }
   0x9   : > { %s25_s17 = ssub.s32 %s621_s12, %s666_s15  ;;  %p35_p0 = scmp.ne.s32.totalorder %s617_s11, %s613_s10 }
   0xa   : > { %p26_p1 = scmp.eq.s32.totalorder %s25_s17, 0  ;;  %p36_p2 = scmp.eq.s32.totalorder %s621_s12, 0 }
   0xb   : > { %p41_p3 = scmp.ne.s32.totalorder %s613_s10, %s609_s9  ;;  %p42_p4 = scmp.eq.s32.totalorder %s662_s13, 0 }
   0xc   : > { %s678_s18 = scalar_select %p26_p1, %s617_s11, %s28_s16  }
   0xd   : > { %p680_p5 = por %p36_p2, %p35_p0  ;;  %p684_p6 = por %p42_p4, %p41_p3 }
   0xe   : > { %p91_p7 = scmp.eq.s32.totalorder %s662_s13, 1  ;;  %p97_p8 = scmp.eq.s32.totalorder %s421_s14, 1 }
   0xf   : > { %p452_p10 = scmp.lt.s32.totalorder %s621_s12, 2  ;;  %s700_s23 = sand.u32 1, %s617_s11  }
  0x10   : > { %p691_p11 = por %p91_p7, %p35_p0  ;;  %p695_p12 = por %p97_p8, %p41_p3 }
  0x11   : > { %s123_s26 = scalar_lea.hbm %s807_s0, %s621_s12  ;;  %s120_s28 = scalar_lea.vmem [#allocation2], %s700_s23 }
  0x12   : > { %s125_s27 = sshll.u32 %s123_s26, 4  ;;  %s127_s29 = sshll.u32 %s120_s28, 4  ;;  %s126_s27 = int_to_ptr.hbm [resolvable:$true] %s125_s27  ;;  %s128_s29 = int_to_ptr.vmem [resolvable:$true] %s127_s29 }
  0x13   : > { %p709_p13 = pnand %p452_p10, %p680_p5  ;;  %p427_p0 = scmp.ge.s32.totalorder %s621_s12, 1 }
  0x14   : > { %p154_p1 = scmp.lt.s32.totalorder %s621_s12, 3  ;;  %s424_s3 = sshll.u32 %s700_s23, 5 }
  0x15   : > { %s118_s4 = scalar_lea.sflag [#allocation3], %s700_s23  ;;  %s491_s5 = sshra.s32 %s126_s27, 4  ;;  %s492_s5 = int_to_ptr.hbm [resolvable:$true] %s491_s5 }
  0x16   : > { %s493_s6 = scalar_lea.hbm %s492_s5, 1  ;;  %p495_p3 = pneg %p709_p13 }
  0x17   : > { %p494_p2 = scmp.ne.s32.totalorder %s492_s5, %s493_s6  ;;  %s498_s14 = scalar_lea.hbm %s807_s0, 2 }
  0x18   : > { %p499_p5 = scmp.lt.s32.totalorder %s492_s5, %s807_s0  ;;  %p500_p8 = scmp.lt.s32.totalorder %s498_s14, %s493_s6 }
  0x19   : > { %p496_p4 = pnand %p495_p3, %p494_p2 }
  0x1a   : > { %p501_p10 = por %p500_p8, %p499_p5 }
  0x1b   : > { %p497_p7 = pneg %p496_p4 }
  0x1d   : > { %p502_p9 = pnand %p501_p10, %p497_p7 }
  0x1f   : > { %505 = shalt.err (!%p502_p9)
}
  0x20   : > { %444 = dma.hbm_to_vmem [thread:$0]  (!%p709_p13), %s126_s27, 16, %s128_s29, %s118_s4  }
  0x21   : > { %p734_p2 = pnand %p427_p0, %p154_p1  ;;  %s434_s24 = sshll.u32 %s621_s12, 5 }
  0x22   : > { %s138_s25 = scalar_lea.vmem [#allocation5], %s424_s3  ;;  %s143_s6 = scalar_lea.hbm %s808_s1, %s434_s24 }
  0x23   : > { %s146_s26 = sshll.u32 %s138_s25, 4  ;;  %s144_s7 = sshll.u32 %s143_s6, 4  ;;  %s147_s26 = int_to_ptr.vmem [resolvable:$true] %s146_s26  ;;  %s145_s7 = int_to_ptr.hbm [resolvable:$true] %s144_s7 }
  0x24   : > { %s135_s8 = scalar_lea.sflag [#allocation6], %s700_s23  ;;  %s521_s14 = sshra.s32 %s145_s7, 4  ;;  %s522_s14 = int_to_ptr.hbm [resolvable:$true] %s521_s14 }
  0x25   : > { %s523_s27 = scalar_lea.hbm %s522_s14, 32  ;;  %s528_s3 = scalar_lea.hbm %s808_s1, 64 }
  0x26   : > { %p524_p9 = scmp.ne.s32.totalorder %s522_s14, %s523_s27  ;;  %p529_p4 = scmp.lt.s32.totalorder %s522_s14, %s808_s1 }
  0x27   : > { %p530_p7 = scmp.lt.s32.totalorder %s528_s3, %s523_s27 }
  0x28   : > { %p526_p0 = pnand %p524_p9, %p495_p3 }
  0x29   : > { %p531_p5 = por %p530_p7, %p529_p4 }
  0x2a   : > { %p527_p1 = pneg %p526_p0 }
  0x2c   : > { %p532_p8 = pnand %p531_p5, %p527_p1 }
  0x2e   : > { %535 = shalt.err (!%p532_p8)
}
  0x2f   : > { %s623_s23 = smov 128   ;;  %s624_s24 = smov 8  }
  0x30   : > { %447 = dma.hbm_to_vmem [thread:$0]  (!%p709_p13), %s145_s7, 512, %s147_s26, %s135_s8, %s623_s23, %s623_s23, %s624_s24  }
  0x31   : > { %158 = sbr.rel (%p734_p2) target bundleno = 386 (0x182), region = 28  ;;  %s757_s25 = sand.u32 (!%p734_p2), 1, %s613_s10  }
  0x32   : > { %s161_s28 = scalar_lea.sflag (!%p734_p2), [#allocation3], %s757_s25  ;;  %s163_s5 = scalar_lea.vmem (!%p734_p2), [#allocation2], %s757_s25 }
  0x36   : > { %596 = dma.done.wait (%p684_p6), %s161_s28, 16  }
  0x37   : > { %598 = vsyncadd (%p684_p6), %s161_s28, 4294967280  ;;  %s428_s30 = sshll.u32 %s757_s25, 5  ;;  %s170_s26 = scalar_lea.sflag [#allocation6], %s757_s25 }
  0x38   : > { %s173_s19 = scalar_lea.vmem [#allocation5], %s428_s30 }
  0x39   : > { %600 = dma.done.wait (%p684_p6), %s170_s26, 512  }
  0x3a   : > { %602 = vsyncadd (%p684_p6), %s170_s26, 4294966784  ;;  %vm204_vm0 = vcmask 130048   ;;  %v200_v0 = vld [vmem:[%s173_s19] sm:$0xff]  ;;  %v201_v1 = vld [vmem:[%s173_s19 + $0x8] sm:$0xff]  ;;  %vm237_vm1 = vcmask 1041409   ;;  %vm239_vm2 = vcmask 1042434  }
  0x3b   : > { %v202_v2 = vld [vmem:[%s173_s19 + $0x10] sm:$0xff]  ;;  %v203_v3 = vld [vmem:[%s173_s19 + $0x18] sm:$0xff]  ;;  %v205_v4 = vsel %vm204_vm0, %v200_v0, 0.0  ;;  %v212_v5 = vsel %vm204_vm0, %v201_v1, 0.0  ;;  %vm241_vm3 = vcmask 1043459   ;;  %s625_s20 = smov 4  }
  0x3c   : > { %v219_v6 = vsel %vm204_vm0, %v202_v2, 0.0  ;;  %v206_v7 = vrot.slane %v205_v4, 4  ;;  %v213_v8 = vrot.slane %v212_v5, 4  ;;  %v226_v10 = vsel %vm204_vm0, %v203_v3, 0.0  ;;  %v490_v38 = vld [vmem:[%s163_s5] ss:$0 sm:$0xff] }
  0x3d   : > { %v220_v9 = vrot.slane %v219_v6, 4  ;;  %v227_v11 = vrot.slane %v226_v10, 4  ;;  %vm284_vm4 = vcmask 31744   ;;  %vm292_vm5 = vcmask 64512   ;;  %s429_s6 = sshll.u32 %s757_s25, 1  ;;  %s431_s7 = sshll.u32 %s662_s13, 1 }
  0x3e   : > { %v207_v12 = vadd.f32 %v206_v7, %v205_v4  ;;  %v214_v13 = vadd.f32 %v213_v8, %v212_v5  ;;  %s327_s27 = scalar_lea.hbm %s809_s2, %s431_s7  ;;  %vm302_vm6 = vcmask 57344   ;;  %s198_s29 = scalar_lea.vmem [#allocation7], %s429_s6 }
  0x3f   : > { %v221_v14 = vadd.f32 %v220_v9, %v219_v6  ;;  %v228_v15 = vadd.f32 %v227_v11, %v226_v10  ;;  %s329_s4 = sshll.u32 %s198_s29, 4  ;;  %s331_s3 = sshll.u32 %s327_s27, 4  ;;  %s330_s4 = int_to_ptr.vmem [resolvable:$true] %s329_s4  ;;  %s332_s3 = int_to_ptr.hbm [resolvable:$true] %s331_s3 }
  0x40   : > { %v208_v16 = vrot.slane %v207_v12, 2  ;;  %v215_v17 = vrot.slane %v214_v13, 2  ;;  %s317_s13 = scalar_lea.sflag [#allocation4], %s757_s25  ;;  %s565_s16 = sshra.s32 %s332_s3, 4  ;;  %s566_s16 = int_to_ptr.hbm [resolvable:$true] %s565_s16 }
  0x41   : > { %v222_v18 = vrot.slane %v221_v14, 2  ;;  %v229_v19 = vrot.slane %v228_v15, 2  ;;  %s567_s17 = scalar_lea.hbm %s566_s16, 2  ;;  %s571_s28 = scalar_lea.hbm %s809_s2, 4 }
  0x42   : > { %v209_v20 = vadd.f32 %v208_v16, %v207_v12  ;;  %v216_v21 = vadd.f32 %v215_v17, %v214_v13  ;;  %p568_p6 = scmp.ne.s32.totalorder %s566_s16, %s567_s17  ;;  %p572_p10 = scmp.lt.s32.totalorder %s566_s16, %s809_s2 }
  0x43   : > { %v223_v22 = vadd.f32 %v222_v18, %v221_v14  ;;  %v230_v23 = vadd.f32 %v229_v19, %v228_v15  ;;  %p573_p2 = scmp.lt.s32.totalorder %s571_s28, %s567_s17 }
  0x44   : > { %v210_v24 = vrot.slane %v209_v20, 1  ;;  %v217_v25 = vrot.slane %v216_v21, 1  ;;  %p569_p13 = pnand %p568_p6, %p691_p11 }
  0x45   : > { %v224_v26 = vrot.slane %v223_v22, 1  ;;  %v231_v27 = vrot.slane %v230_v23, 1  ;;  %p574_p9 = por %p573_p2, %p572_p10 }
  0x46   : > { %v211_v28 = vadd.f32 %v210_v24, %v209_v20  ;;  %v218_v29 = vadd.f32 %v217_v25, %v216_v21  ;;  %p570_p3 = pneg %p569_p13 }
  0x47   : > { %v225_v30 = vadd.f32 %v224_v26, %v223_v22  ;;  %v232_v31 = vadd.f32 %v231_v27, %v230_v23 }
  0x48   : > { %v238_v32 = vsel %vm237_vm1, %v218_v29, %v211_v28  ;;  %p575_p0 = pnand %p574_p9, %p570_p3 }
  0x49   : > { %v240_v33 = vsel %vm239_vm2, %v225_v30, %v238_v32 }
  0x4a   : > { %v242_v34 = vsel %vm241_vm3, %v232_v31, %v240_v33 }
  0x4b   : > { %244 = vxpose.xlu0.b32.start.end [1/1] (short) (narrow) %v242_v34, 16 }
  0xef   : > { %v260_v35 = vpop.trf.xlu0 }
  0xf0   : > { %278 = vrot.lane.b32.xlu0 %v260_v35, %s625_s20 }
  0xf7   : > { %v261_v36 = vpop.trf.xlu0 }
  0xf8   : > { %280 = vrot.lane.b32.xlu1 %v261_v36, %s625_s20 }
 0x162   : > { %v279_v37 = vpop.permute.xlu0 %278 }
 0x163   : > { %v285_v39 = vsel %vm284_vm4, %v260_v35, %v279_v37 }
 0x164   : > { %v290_v40 = vmul.f32 %v490_v38, %v285_v39 }
 0x166   : > { %v304_v43 = vmul.f32 %v290_v40, %v290_v40  ;;  %v293_v45 = vsel %vm292_vm5, %v290_v40, 0.0 }
 0x168   : > { %v306_v49 = vsel %vm292_vm5, %v304_v43, 0.0 }
 0x16a   : > { %v281_v41 = vpop.permute.xlu1 %280 }
 0x16b   : > { %v286_v42 = vsel %vm284_vm4, %v261_v36, %v281_v41 }
 0x16c   : > { %v291_v44 = vmul.f32 %v490_v38, %v286_v42 }
 0x16e   : > { %v294_v46 = vsel %vm292_vm5, %v291_v44, 0.0  ;;  %v305_v47 = vmul.f32 %v291_v44, %v291_v44 }
 0x16f   : > { %v295_v48 = vadd.f32 %v294_v46, %v293_v45 }
 0x170   : > { %v307_v50 = vsel %vm292_vm5, %v305_v47, 0.0 }
 0x171   : > { %v296_v51 = vrot.slane %v295_v48, 4  ;;  %v308_v52 = vadd.f32 %v307_v50, %v306_v49 }
 0x173   : > { %v297_v53 = vadd.f32 %v296_v51, %v295_v48  ;;  %v309_v54 = vrot.slane %v308_v52, 4 }
 0x175   : > { %v298_v55 = vrot.slane %v297_v53, 2  ;;  %v310_v56 = vadd.f32 %v309_v54, %v308_v52 }
 0x177   : > { %v299_v57 = vadd.f32 %v298_v55, %v297_v53  ;;  %v311_v58 = vrot.slane %v310_v56, 2 }
 0x179   : > { %v300_v59 = vrot.slane %v299_v57, 1  ;;  %v312_v60 = vadd.f32 %v311_v58, %v310_v56 }
 0x17b   : > { %v301_v61 = vadd.f32 %v300_v59, %v299_v57  ;;  %v313_v62 = vrot.slane %v312_v60, 1 }
 0x17d   : > { %v314_v63 = vadd.f32 %v313_v62, %v312_v60  ;;  %303 = vst.msk [vmem:[%s198_s29] sm:$0x1] %vm302_vm6, %v301_v61 }
 0x17f   : > { %315 = vst.msk [vmem:[%s198_s29 + $0x1] sm:$0x1] %vm302_vm6, %v314_v63 }
 0x180   : > { %578 = shalt.err (!%p575_p0)
}
 0x181   : > { %439 = dma.vmem_to_hbm [thread:$0]  (%p691_p11), %s330_s4, 32, %s332_s3, %s317_s13  }
 0x182 PF: > { %s343_s25 = sand.u32 1, %s609_s9   ;;  %p816_p1 = scmp.ge.s32.totalorder %s621_s12, 2 }
 0x183   : > { %s344_s26 = scalar_lea.sflag [#allocation4], %s343_s25 }
 0x184   : > { %p449_p4 = pnand %p816_p1, %p695_p12 }
 0x186   : > { %p450_p7 = pneg %p449_p4 }
 0x188   : > { %604 = dma.done.wait (%p450_p7), %s344_s26, 32  }
 0x189   : > { %606 = vsyncadd (%p450_p7), %s344_s26, 4294967264  ;;  %p18_p5 = scmp.ge.s32.totalorder %s666_s15, 4   ;;  %s817_s9 = smov %s613_s10 }
 0x18a   : > { %s818_s10 = smov %s617_s11  ;;  %s819_s11 = smov %s678_s18 }
 0x18b   : > { %s820_s12 = smov %s666_s15  ;;  %20 = sbr.rel (!%p18_p5) target bundleno = 7 (0x7), region = 86 }
 0x190   :  { %350 = vsyncpa [#allocation3], 1 }
 0x191   :  { %352 = vsyncpa [#allocation3 + $0x1], 1 }
 0x192   :  { %353 = vsyncpa [#allocation6], 1 }
 0x193   :  { %355 = vsyncpa [#allocation6 + $0x1], 1 }
 0x194   :  { %356 = vsyncpa [#allocation4], 1 }
 0x195   :  { %358 = vsyncpa [#allocation4 + $0x1], 1 }

</bundles_post_ra>
